<compile_context>
chip_gen: v7x
topology: tpu7x:2x2x1
jax: 0.10.0
libtpu: 0.0.40
codegen_flags: <defaults>
</compile_context>

<pallas_src>
import jax
import jax.numpy as jnp
from jax.experimental import pallas as pl
from jax.experimental.pallas import tpu as pltpu

HIDDEN = 32            # synthetic DINs hidden width
OUT_CH = 2             # DINs outputs 2-class logits
MAX_VOXEL_BLOCK = 16384  # cap on voxels per grid step (lane axis)
TARGET_GRID_STEPS = 8    # aim for >=4 steps per TC after a v7x megacore split


def _round_up(a: int, b: int) -> int:
    return ((a + b - 1) // b) * b


def _choose_block(n: int) -> int:
    """Voxel block (multiple of 128): ~TARGET_GRID_STEPS steps, capped at 16K."""
    blk = _round_up(max(pl.cdiv(n, TARGET_GRID_STEPS), 128), 128)
    blk = min(blk, MAX_VOXEL_BLOCK, _round_up(n, 128))
    return blk


def _dins_mlp_kernel(x_ref, w1_ref, b1_ref, w2_ref, b2_ref, w3_ref, b3_ref, o_ref):
    """Per-voxel MLP (1x1x1-conv stack); voxels lane-dense on the 128-lane axis.

    x_ref : (C, BLK)          f32  lane-dense voxel tile
    w1    : (HIDDEN, C)       f32  layer-1 weights (VPU path)
    b1    : (HIDDEN, 1)       f32
    w2    : (HIDDEN, HIDDEN)  bf16 MXU weights
    b2    : (HIDDEN, 1)       f32
    w3    : (OUT_CH, HIDDEN)  bf16 MXU weights
    b3    : (OUT_CH, 1)       f32
    o_ref : (OUT_CH, BLK)     f32  lane-dense logits tile
    """
    c = x_ref.shape[0]
    x = x_ref[...]                       # (C, BLK) f32
    w1 = w1_ref[...]                     # (HIDDEN, C) f32

    # Layer 1 (C -> HIDDEN) on the VPU: K = C is tiny, so an MXU matmul would
    # pay full column-streaming time for ~C/HIDDEN of the useful MACs.
    # Broadcast multiply-adds in f32 (v5e has no bf16 VPU); bias folded into
    # the accumulator init.  C is a tiny static constant, so the Python loop
    # is a 1-2 statement unroll, not a live-range problem.
    acc = b1_ref[...] + w1[:, 0:1] * x[0:1, :]            # (HIDDEN, BLK)
    for ci in range(1, c):
        acc = acc + w1[:, ci:ci + 1] * x[ci:ci + 1, :]
    h = jnp.maximum(acc, 0.0)

    # Layers 2 and 3 on the MXU: bf16 operands, f32 accumulation.
    h = jnp.dot(w2_ref[...], h.astype(jnp.bfloat16),
                preferred_element_type=jnp.float32) + b2_ref[...]
    h = jnp.maximum(h, 0.0)
    o = jnp.dot(w3_ref[...], h.astype(jnp.bfloat16),
                preferred_element_type=jnp.float32) + b3_ref[...]
    o_ref[...] = o.astype(o_ref.dtype)


def pallas_voxel_mlp(vox_t, params):
    """vox_t: (C, N) f32 (voxels on the minor axis) -> (OUT_CH, N) f32 logits."""
    c, n = vox_t.shape
    w1, b1, w2, b2, w3, b3 = params

    blk = _choose_block(n)
    grid = (pl.cdiv(n, blk),)            # ragged tail masked by Pallas, no pad copy

    flops = 2 * n * (c * HIDDEN + HIDDEN * HIDDEN + HIDDEN * OUT_CH)
    bytes_accessed = (4 * n * (c + OUT_CH)                      # voxel in + logits out
                      + 4 * (HIDDEN * c + HIDDEN + HIDDEN + OUT_CH)   # f32 weights/biases
                      + 2 * (HIDDEN * HIDDEN + OUT_CH * HIDDEN))      # bf16 weights
    cost = pl.CostEstimate(flops=flops, transcendentals=0,
                           bytes_accessed=bytes_accessed)

    return pl.pallas_call(
        _dins_mlp_kernel,
        out_shape=jax.ShapeDtypeStruct((OUT_CH, n), jnp.float32),
        grid_spec=pltpu.PrefetchScalarGridSpec(
            num_scalar_prefetch=0,
            grid=grid,
            in_specs=[
                pl.BlockSpec((c, blk), lambda i: (0, i)),           # voxel tile (lane-dense)
                pl.BlockSpec((HIDDEN, c), lambda i: (0, 0)),        # W1 (resident, f32)
                pl.BlockSpec((HIDDEN, 1), lambda i: (0, 0)),        # b1
                pl.BlockSpec((HIDDEN, HIDDEN), lambda i: (0, 0)),   # W2 (resident, bf16)
                pl.BlockSpec((HIDDEN, 1), lambda i: (0, 0)),        # b2
                pl.BlockSpec((OUT_CH, HIDDEN), lambda i: (0, 0)),   # W3 (resident, bf16)
                pl.BlockSpec((OUT_CH, 1), lambda i: (0, 0)),        # b3
            ],
            out_specs=pl.BlockSpec((OUT_CH, blk), lambda i: (0, i)),
        ),
        compiler_params=pltpu.CompilerParams(
            dimension_semantics=("parallel",),      # voxel axis -> megacore split on v7x
            vmem_limit_bytes=32 * 1024 * 1024,
        ),
        cost_estimate=cost,
    )(vox_t, w1, b1, w2, b2, w3, b3)


def init_params(key, c_in):
    """Deterministic synthetic DINs weights (no checkpoint load).

    W1 kept f32 (consumed on the VPU); W2/W3 stored bf16 (consumed on the MXU
    with f32 accumulation); biases f32.
    """
    k1, k2, k3 = jax.random.split(key, 3)
    s = 0.1
    w1 = s * jax.random.normal(k1, (HIDDEN, c_in), jnp.float32)
    b1 = jnp.zeros((HIDDEN, 1), jnp.float32)
    w2 = (s * jax.random.normal(k2, (HIDDEN, HIDDEN), jnp.float32)).astype(jnp.bfloat16)
    b2 = jnp.zeros((HIDDEN, 1), jnp.float32)
    w3 = (s * jax.random.normal(k3, (OUT_CH, HIDDEN), jnp.float32)).astype(jnp.bfloat16)
    b3 = jnp.zeros((OUT_CH, 1), jnp.float32)
    return (w1, b1, w2, b2, w3, b3)


def dins_forward(x, params):
    """Reproduces DINsNetwork.forward: (B,H,W,D,C) -> (B,H,W,D,2) float32 logits.

    The reference wrapper's channel-first permute / image-guide split / permute
    back is a no-op for the per-voxel body, so it is elided.  Only a single
    (N, C) -> (C, N) layout change remains so the Pallas kernel sees a
    lane-dense voxel axis, plus the matching un-transpose of the logits.
    """
    B, H, W, D, C = x.shape
    n = B * H * W * D
    vox_t = jnp.transpose(x.reshape(n, C).astype(jnp.float32))      # (C, N), lane-dense
    logits_t = pallas_voxel_mlp(vox_t, params)                      # (OUT_CH, N)
    out = jnp.transpose(logits_t).reshape(B, H, W, D, OUT_CH)       # back to channel-last
    return out.astype(jnp.float32)


if __name__ == "__main__":
    B, H, W, D, C = 2, 16, 16, 16, 2   # 1 image channel + 1 guidance channel
    key = jax.random.PRNGKey(0)
    x = jax.random.normal(key, (B, H, W, D, C), dtype=jnp.float32)
    params = init_params(jax.random.PRNGKey(42), C)

    fwd = jax.jit(lambda xx: dins_forward(xx, params))
    out = jax.block_until_ready(fwd(x))

    assert out.shape == (B, H, W, D, OUT_CH), out.shape
    assert out.dtype == jnp.float32
    assert bool(jnp.all(jnp.isfinite(out)))

    # Pure-JAX reference of the same synthetic DINs body (per-voxel MLP),
    # mirroring the kernel's numerics (f32 VPU layer 1, bf16-operand MXU
    # layers 2/3 with f32 accumulation).
    w1, b1, w2, b2, w3, b3 = params
    v = x.reshape(-1, C).astype(jnp.float32)
    h = b1[:, 0][None, :] + sum(v[:, ci:ci + 1] * w1[:, ci][None, :] for ci in range(C))
    h = jnp.maximum(h, 0.0)
    h = jnp.maximum(
        jnp.dot(h.astype(jnp.bfloat16), w2.T, preferred_element_type=jnp.float32)
        + b2[:, 0], 0.0)
    ref = (jnp.dot(h.astype(jnp.bfloat16), w3.T, preferred_element_type=jnp.float32)
           + b3[:, 0]).reshape(B, H, W, D, OUT_CH)
    assert bool(jnp.allclose(out, ref, atol=1e-2, rtol=1e-2)), "mismatch vs pure-JAX reference"

    print("KERNEL_OK")
</pallas_src>

<mosaic_0001>
module attributes {stable_mosaic.version = 11 : i64} {
  func.func @_dins_mlp_kernel(%arg0: i32, %arg1: memref<2x1024xf32, #tpu.memory_space<vmem>>, %arg2: memref<32x2xf32, #tpu.memory_space<vmem>>, %arg3: memref<32x1xf32, #tpu.memory_space<vmem>>, %arg4: memref<32x32xbf16, #tpu.memory_space<vmem>>, %arg5: memref<32x1xf32, #tpu.memory_space<vmem>>, %arg6: memref<2x32xbf16, #tpu.memory_space<vmem>>, %arg7: memref<2x1xf32, #tpu.memory_space<vmem>>, %arg8: memref<2x1024xf32, #tpu.memory_space<vmem>>) attributes {dimension_semantics = [#tpu.dimension_semantics<parallel>], iteration_bounds = array<i64: 8>, scalar_prefetch = 0 : i64, scratch_operands = 0 : i64, tpu.core_type = #tpu.core_type<tc>, window_params = [{transform_indices = @transform_0, window_bounds = array<i64: 2, 1024>}, {pipeline_mode = #tpu.pipeline_mode<synchronous>, transform_indices = @transform_1, window_bounds = array<i64: 32, 2>}, {pipeline_mode = #tpu.pipeline_mode<synchronous>, transform_indices = @transform_2, window_bounds = array<i64: 32, 1>}, {pipeline_mode = #tpu.pipeline_mode<synchronous>, transform_indices = @transform_3, window_bounds = array<i64: 32, 32>}, {pipeline_mode = #tpu.pipeline_mode<synchronous>, transform_indices = @transform_4, window_bounds = array<i64: 32, 1>}, {pipeline_mode = #tpu.pipeline_mode<synchronous>, transform_indices = @transform_5, window_bounds = array<i64: 2, 32>}, {pipeline_mode = #tpu.pipeline_mode<synchronous>, transform_indices = @transform_6, window_bounds = array<i64: 2, 1>}, {transform_indices = @transform_7, window_bounds = array<i64: 2, 1024>}]} {
    %c0 = arith.constant 0 : index
    %c0_0 = arith.constant 0 : index
    %0 = vector.load %arg1[%c0, %c0_0] : memref<2x1024xf32, #tpu.memory_space<vmem>>, vector<2x1024xf32>
    %c0_1 = arith.constant 0 : index
    %c0_2 = arith.constant 0 : index
    %1 = vector.load %arg2[%c0_1, %c0_2] : memref<32x2xf32, #tpu.memory_space<vmem>>, vector<32x2xf32>
    %c0_3 = arith.constant 0 : index
    %c0_4 = arith.constant 0 : index
    %2 = vector.load %arg3[%c0_3, %c0_4] : memref<32x1xf32, #tpu.memory_space<vmem>>, vector<32x1xf32>
    %3 = vector.extract_strided_slice %1 {offsets = [0, 0], sizes = [32, 1], strides = [1, 1]} : vector<32x2xf32> to vector<32x1xf32>
    %4 = vector.extract_strided_slice %0 {offsets = [0, 0], sizes = [1, 1024], strides = [1, 1]} : vector<2x1024xf32> to vector<1x1024xf32>
    %5 = vector.broadcast %3 : vector<32x1xf32> to vector<32x1024xf32>
    %6 = vector.broadcast %4 : vector<1x1024xf32> to vector<32x1024xf32>
    %7 = arith.mulf %5, %6 : vector<32x1024xf32>
    %8 = vector.broadcast %2 : vector<32x1xf32> to vector<32x1024xf32>
    %9 = arith.addf %8, %7 : vector<32x1024xf32>
    %10 = vector.extract_strided_slice %1 {offsets = [0, 1], sizes = [32, 1], strides = [1, 1]} : vector<32x2xf32> to vector<32x1xf32>
    %11 = vector.extract_strided_slice %0 {offsets = [1, 0], sizes = [1, 1024], strides = [1, 1]} : vector<2x1024xf32> to vector<1x1024xf32>
    %12 = vector.broadcast %10 : vector<32x1xf32> to vector<32x1024xf32>
    %13 = vector.broadcast %11 : vector<1x1024xf32> to vector<32x1024xf32>
    %14 = arith.mulf %12, %13 : vector<32x1024xf32>
    %15 = arith.addf %9, %14 : vector<32x1024xf32>
    %cst = arith.constant 0.000000e+00 : f32
    %16 = vector.broadcast %cst : f32 to vector<32x1024xf32>
    %17 = arith.maximumf %15, %16 : vector<32x1024xf32>
    %c0_5 = arith.constant 0 : index
    %c0_6 = arith.constant 0 : index
    %18 = vector.load %arg4[%c0_5, %c0_6] : memref<32x32xbf16, #tpu.memory_space<vmem>>, vector<32x32xbf16>
    %19 = arith.truncf %17 : vector<32x1024xf32> to vector<32x1024xbf16>
    %cst_7 = arith.constant dense<0.000000e+00> : vector<32x1024xf32>
    %20 = tpu.matmul %18, %19, %cst_7 {dimension_numbers = #tpu.dot_dimension_numbers<[1], [0], [0], [1], [0, 0, 1, 1], [], []>} : vector<32x32xbf16>, vector<32x1024xbf16>, vector<32x1024xf32> -> vector<32x1024xf32>
    %c0_8 = arith.constant 0 : index
    %c0_9 = arith.constant 0 : index
    %21 = vector.load %arg5[%c0_8, %c0_9] : memref<32x1xf32, #tpu.memory_space<vmem>>, vector<32x1xf32>
    %22 = vector.broadcast %21 : vector<32x1xf32> to vector<32x1024xf32>
    %23 = arith.addf %20, %22 : vector<32x1024xf32>
    %cst_10 = arith.constant 0.000000e+00 : f32
    %24 = vector.broadcast %cst_10 : f32 to vector<32x1024xf32>
    %25 = arith.maximumf %23, %24 : vector<32x1024xf32>
    %c0_11 = arith.constant 0 : index
    %c0_12 = arith.constant 0 : index
    %26 = vector.load %arg6[%c0_11, %c0_12] : memref<2x32xbf16, #tpu.memory_space<vmem>>, vector<2x32xbf16>
    %27 = arith.truncf %25 : vector<32x1024xf32> to vector<32x1024xbf16>
    %cst_13 = arith.constant dense<0.000000e+00> : vector<2x1024xf32>
    %28 = tpu.matmul %26, %27, %cst_13 {dimension_numbers = #tpu.dot_dimension_numbers<[1], [0], [0], [1], [0, 0, 1, 1], [], []>} : vector<2x32xbf16>, vector<32x1024xbf16>, vector<2x1024xf32> -> vector<2x1024xf32>
    %c0_14 = arith.constant 0 : index
    %c0_15 = arith.constant 0 : index
    %29 = vector.load %arg7[%c0_14, %c0_15] : memref<2x1xf32, #tpu.memory_space<vmem>>, vector<2x1xf32>
    %30 = vector.broadcast %29 : vector<2x1xf32> to vector<2x1024xf32>
    %31 = arith.addf %28, %30 : vector<2x1024xf32>
    %c0_16 = arith.constant 0 : index
    %c0_17 = arith.constant 0 : index
    %32 = vector.load %arg8[%c0_16, %c0_17] : memref<2x1024xf32, #tpu.memory_space<vmem>>, vector<2x1024xf32>
    tpu.vector_store %arg8[%c0_16, %c0_17], %31 {strides = array<i32>} : memref<2x1024xf32, #tpu.memory_space<vmem>>, vector<2x1024xf32>,
    return
  }
  func.func @transform_0(%arg0: i32) -> (i32, i32) {
    %c0_i32 = arith.constant 0 : i32
    %c0_i32_0 = arith.constant 0 : i32
    return %c0_i32, %arg0 : i32, i32
  }
  func.func @transform_1(%arg0: i32) -> (i32, i32) {
    %c0_i32 = arith.constant 0 : i32
    %c0_i32_0 = arith.constant 0 : i32
    %c0_i32_1 = arith.constant 0 : i32
    return %c0_i32, %c0_i32_0 : i32, i32
  }
  func.func @transform_2(%arg0: i32) -> (i32, i32) {
    %c0_i32 = arith.constant 0 : i32
    %c0_i32_0 = arith.constant 0 : i32
    %c0_i32_1 = arith.constant 0 : i32
    return %c0_i32, %c0_i32_0 : i32, i32
  }
  func.func @transform_3(%arg0: i32) -> (i32, i32) {
    %c0_i32 = arith.constant 0 : i32
    %c0_i32_0 = arith.constant 0 : i32
    %c0_i32_1 = arith.constant 0 : i32
    return %c0_i32, %c0_i32_0 : i32, i32
  }
  func.func @transform_4(%arg0: i32) -> (i32, i32) {
    %c0_i32 = arith.constant 0 : i32
    %c0_i32_0 = arith.constant 0 : i32
    %c0_i32_1 = arith.constant 0 : i32
    return %c0_i32, %c0_i32_0 : i32, i32
  }
  func.func @transform_5(%arg0: i32) -> (i32, i32) {
    %c0_i32 = arith.constant 0 : i32
    %c0_i32_0 = arith.constant 0 : i32
    %c0_i32_1 = arith.constant 0 : i32
    return %c0_i32, %c0_i32_0 : i32, i32
  }
  func.func @transform_6(%arg0: i32) -> (i32, i32) {
    %c0_i32 = arith.constant 0 : i32
    %c0_i32_0 = arith.constant 0 : i32
    %c0_i32_1 = arith.constant 0 : i32
    return %c0_i32, %c0_i32_0 : i32, i32
  }
  func.func @transform_7(%arg0: i32) -> (i32, i32) {
    %c0_i32 = arith.constant 0 : i32
    %c0_i32_0 = arith.constant 0 : i32
    return %c0_i32, %arg0 : i32, i32
  }
}

</mosaic_0001>

<bundles_post_ra>
// kernel: _lambda_.1
= control target key start
LH: loop header
LB: loop body
LE: loop exit
PB: predicated region body
PF: predicated region fallthrough
CT: control target
= control target key end

     0   :  { %s1349_s24 = smov 0   ;;  %s1705_s0 = inlined_call_operand.vmem [shape: f32[2,8192], index: 0, kind: input, shape index: {}]   ;;  %s1706_s1 = inlined_call_operand.vmem [shape: f32[32,2], index: 1, kind: input, shape index: {}]   ;;  %s1707_s2 = inlined_call_operand.vmem [shape: f32[32,1], index: 2, kind: input, shape index: {}, may-alias: {2,4}]   ;;  %s1708_s3 = inlined_call_operand.vmem [shape: bf16[32,32], index: 3, kind: input, shape index: {}]   ;;  %s1709_s4 = inlined_call_operand.vmem [shape: f32[32,1], index: 4, kind: input, shape index: {}, may-alias: {2,4}]   ;;  %s1710_s5 = inlined_call_operand.vmem [shape: bf16[2,32], index: 5, kind: input, shape index: {}]   ;;  %s1711_s6 = inlined_call_operand.vmem [shape: f32[2,1], index: 6, kind: input, shape index: {}]   ;;  %s1712_s7 = inlined_call_operand.vmem [shape: f32[2,8192], index: 7, kind: output, shape index: {}]  }
   0x1 LB: > { %s1252_s25 = sadd.s32 4294967295, %s1304_s24   ;;  %p1256_p0 = scmp.ge.s32.totalorder %s1304_s24, 1  ;;  %s1304_s24 = sphi %s1349_s24, %s17_s24  }
   0x2   : > { %p238_p1 = scmp.lt.s32.totalorder %s1304_s24, 9 }
   0x4   : > { %p239_p2 = pnand %p1256_p0, %p238_p1 }
   0x5   : > { %v289_v0 = vld [vmem:[%s1707_s2] sm:$0xff] (!%p239_p2)  ;;  %v1306_v2 = vmov (!%p239_p2), 0   ;;  %v290_v3 = vld [vmem:[%s1707_s2 + $0x8] sm:$0xff] (!%p239_p2)  ;;  %v288_v5 = vld [vmem:[%s1706_s1 + $0x18] sm:$0xff] (!%p239_p2)  ;;  %v1307_v6 = vmov (!%p239_p2), 1   ;;  %s1257_s8 = sshll.u32 (!%p239_p2), %s1252_s25, 3  ;;  %v315_v15 = vlaneseq (!%p239_p2) }
   0x6   : > { %242 = sbr.rel (%p239_p2) target bundleno = 646 (0x286), region = 48  ;;  %v285_v1 = vld [vmem:[%s1706_s1] sm:$0xff] (!%p239_p2)  ;;  %1289 = vset.pattern.permute.xlu1 (!%p239_p2), %v1306_v2  ;;  %1288 = vset.pattern.permute.xlu0 (!%p239_p2), %v1306_v2  ;;  %v286_v4 = vld [vmem:[%s1706_s1 + $0x8] sm:$0xff] (!%p239_p2)  ;;  %v287_v7 = vld [vmem:[%s1706_s1 + $0x10] sm:$0xff] (!%p239_p2)  ;;  %p271_p3 = scmp.lt.s32.totalorder (!%p239_p2), %s1257_s8, 63  ;;  %vm709_vm0 = vcmask (!%p239_p2), 261120  }
   0x7   : > { %421 = vperm.xlu1 (!%p239_p2), %1289, %v289_v0   ;;  %295 = vperm.xlu0 (!%p239_p2), %1288, %v285_v1   ;;  %v291_v8 = vld [vmem:[%s1707_s2 + $0x10] sm:$0xff] (!%p239_p2)  ;;  %v292_v9 = vld [vmem:[%s1707_s2 + $0x18] sm:$0xff] (!%p239_p2)  ;;  %v675_v10 = vld [vmem:[%s1709_s4] sm:$0xff] (!%p239_p2)  ;;  %v1408_v16 = vshrl.u32 (!%p239_p2), %v315_v15, 7 }
   0x8   : > { %748 = vmatprep.mubr.bf16.mxu0 (!%p239_p2), %v1306_v2  ;;  %801 = vmatprep.mubr.bf16.mxu1 (!%p239_p2), %v1306_v2  ;;  %v676_v11 = vld [vmem:[%s1709_s4 + $0x8] sm:$0xff] (!%p239_p2)  ;;  %v677_v12 = vld [vmem:[%s1709_s4 + $0x10] sm:$0xff] (!%p239_p2)  ;;  %v977_v13 = vld [vmem:[%s1711_s6] sm:$0x3] (!%p239_p2) }
   0x9   : > { %v678_v14 = vld [vmem:[%s1709_s4 + $0x18] sm:$0xff] (!%p239_p2)  ;;  %v317_v17 = vsub.s32 (!%p239_p2), 0, %v1408_v16  ;;  %v321_v18 = vsub.s32 (!%p239_p2), 2, %v1408_v16  ;;  %v329_v19 = vsub.s32 (!%p239_p2), 6, %v1408_v16  ;;  %v325_v20 = vsub.s32 (!%p239_p2), 4, %v1408_v16 }
   0xa   : > { %v489_v23 = vsub.s32 (!%p239_p2), 1, %v1408_v16  ;;  %v493_v24 = vsub.s32 (!%p239_p2), 3, %v1408_v16  ;;  %v501_v25 = vsub.s32 (!%p239_p2), 7, %v1408_v16  ;;  %v497_v26 = vsub.s32 (!%p239_p2), 5, %v1408_v16 }
   0xb   : > { %426 = vperm.xlu1 (!%p239_p2), %1289, %v290_v3   ;;  %300 = vperm.xlu0 (!%p239_p2), %1288, %v286_v4  }
   0xd   : > { %s1714_s8 = smov (!%p271_p3, %s1257_s8), 63 }
   0xe   : > { %s1258_s9 = sshll.u32 %s1714_s8, 1 }
   0xf   : > { %1290 = vset.pattern.permute.xlu1 %v1307_v6  ;;  %310 = vperm.xlu0 %1288, %v288_v5   ;;  %s274_s12 = scalar_lea.vmem %s1705_s0, %s1258_s9  ;;  %s280_s20 = scalar_lea.vmem %s1712_s7, %s1258_s9 }
  0x10   : > { %476 = vperm.xlu1 %1290, %v286_v4   ;;  %v283_v21 = vld [vmem:[%s274_s12] sm:$0xff]  ;;  %v284_v22 = vld [vmem:[%s274_s12 + $0x8] sm:$0xff] }
  0x11   : > { %v322_v27 = vrot.slane %v283_v21, %v321_v18  ;;  %v330_v28 = vrot.slane %v283_v21, %v329_v19  ;;  %v318_v29 = vrot.slane %v283_v21, %v317_v17  ;;  %v326_v30 = vrot.slane %v283_v21, %v325_v20 }
  0x12   : > { %v342_v31 = vrot.slane %v284_v22, %v325_v20  ;;  %v338_v32 = vrot.slane %v284_v22, %v321_v18  ;;  %v346_v33 = vrot.slane %v284_v22, %v329_v19  ;;  %v334_v34 = vrot.slane %v284_v22, %v317_v17 }
  0x13   : > { %1292 = vset.pattern.permute.xlu0 %v1307_v6  ;;  %v494_v35 = vrot.slane %v283_v21, %v493_v24  ;;  %v502_v36 = vrot.slane %v283_v21, %v501_v25  ;;  %v490_v37 = vrot.slane %v283_v21, %v489_v23  ;;  %v498_v38 = vrot.slane %v283_v21, %v497_v26 }
  0x14   : > { %1291 = vset.pattern.permute.xlu1 %v1306_v2  ;;  %472 = vperm.xlu0 %1292, %v285_v1   ;;  %v514_v39 = vrot.slane %v284_v22, %v497_v26  ;;  %v510_v40 = vrot.slane %v284_v22, %v493_v24  ;;  %v518_v41 = vrot.slane %v284_v22, %v501_v25 }
  0x15   : > { %305 = vperm.xlu1 %1291, %v287_v7   ;;  %v506_v42 = vrot.slane %v284_v22, %v489_v23  ;;  %v1423_v43 = vrot.slane %v322_v27, %v317_v17  ;;  %v1425_v44 = vrot.slane %v330_v28, %v317_v17  ;;  %v1427_v45 = vrot.slane %v318_v29, %v317_v17 }
  0x16   : > { %v1429_v46 = vrot.slane %v326_v30, %v317_v17  ;;  %v1431_v47 = vrot.slane %v338_v32, %v317_v17  ;;  %v1433_v48 = vrot.slane %v346_v33, %v317_v17  ;;  %v1435_v49 = vrot.slane %v334_v34, %v317_v17 }
  0x17   : > { %v1437_v50 = vrot.slane %v342_v31, %v317_v17  ;;  %v1439_v51 = vrot.slane %v494_v35, %v489_v23  ;;  %v1441_v52 = vrot.slane %v502_v36, %v489_v23  ;;  %v1443_v53 = vrot.slane %v490_v37, %v489_v23 }
  0x18   : > { %480 = vperm.xlu0 %1292, %v287_v7   ;;  %v1445_v54 = vrot.slane %v498_v38, %v489_v23  ;;  %v1447_v57 = vrot.slane %v510_v40, %v489_v23  ;;  %v1449_v58 = vrot.slane %v518_v41, %v489_v23  ;;  %v1451_v59 = vrot.slane %v506_v42, %v489_v23 }
  0x19   : > { %431 = vperm.xlu1 %1291, %v291_v8   ;;  %v1453_v60 = vrot.slane %v514_v39, %v489_v23 }
  0x1c   : > { %1295 = vset.pattern.permute.xlu0 %v1306_v2 }
  0x1d   : > { %436 = vperm.xlu1 %1291, %v292_v9   ;;  %686 = vperm.xlu0 %1295, %v676_v11  }
  0x21   : > { %1293 = vset.pattern.permute.xlu1 %v1307_v6  ;;  %980 = vperm.xlu0 %1295, %v977_v13  }
  0x22   : > { %484 = vperm.xlu1 %1293, %v288_v5  }
  0x26   : > { %1294 = vset.pattern.permute.xlu1 %v1306_v2 }
  0x27   : > { %681 = vperm.xlu1 %1294, %v675_v10  }
  0x2b   : > { %691 = vperm.xlu1 %1294, %v677_v12  }
  0x2f   : > { %696 = vperm.xlu1 %1294, %v678_v14  }
  0x86   : > { %v422_v55 = vpop.permute.xlu1 %421  ;;  %v296_v56 = vpop.permute.xlu0 %295 }
  0x87   : > { %v388_v61 = vmul.f32 %v1423_v43, %v296_v56  ;;  %v390_v62 = vmul.f32 %v1425_v44, %v296_v56  ;;  %v387_v63 = vmul.f32 %v1427_v45, %v296_v56  ;;  %v389_v0 = vmul.f32 %v1429_v46, %v296_v56 }
  0x88   : > { %v392_v1 = vmul.f32 %v1431_v47, %v296_v56  ;;  %v394_v3 = vmul.f32 %v1433_v48, %v296_v56  ;;  %v391_v4 = vmul.f32 %v1435_v49, %v296_v56  ;;  %v393_v5 = vmul.f32 %v1437_v50, %v296_v56 }
  0x89   : > { %v440_v6 = vadd.f32 %v422_v55, %v388_v61  ;;  %v442_v7 = vadd.f32 %v422_v55, %v390_v62  ;;  %v439_v8 = vadd.f32 %v422_v55, %v387_v63  ;;  %v441_v9 = vadd.f32 %v422_v55, %v389_v0 }
  0x8a   : > { %v427_v10 = vpop.permute.xlu1 %426  ;;  %v301_v11 = vpop.permute.xlu0 %300  ;;  %v1463_v12 = vadd.f32 %v422_v55, %v392_v1  ;;  %v1465_v13 = vadd.f32 %v422_v55, %v394_v3  ;;  %v1467_v14 = vadd.f32 %v422_v55, %v391_v4  ;;  %v1469_v15 = vadd.f32 %v422_v55, %v393_v5 }
  0x8b   : > { %v396_v17 = vmul.f32 %v1423_v43, %v301_v11  ;;  %v398_v18 = vmul.f32 %v1425_v44, %v301_v11  ;;  %v395_v19 = vmul.f32 %v1427_v45, %v301_v11  ;;  %v397_v20 = vmul.f32 %v1429_v46, %v301_v11 }
  0x8c   : > { %v400_v21 = vmul.f32 %v1431_v47, %v301_v11  ;;  %v402_v22 = vmul.f32 %v1433_v48, %v301_v11  ;;  %v399_v23 = vmul.f32 %v1435_v49, %v301_v11  ;;  %v401_v24 = vmul.f32 %v1437_v50, %v301_v11 }
  0x8d   : > { %v448_v25 = vadd.f32 %v427_v10, %v396_v17  ;;  %v450_v26 = vadd.f32 %v427_v10, %v398_v18  ;;  %v447_v27 = vadd.f32 %v427_v10, %v395_v19  ;;  %v449_v28 = vadd.f32 %v427_v10, %v397_v20 }
  0x8e   : > { %v1479_v29 = vpop.permute.xlu0 %310  ;;  %v452_v30 = vadd.f32 %v427_v10, %v400_v21  ;;  %v454_v31 = vadd.f32 %v427_v10, %v402_v22  ;;  %v451_v32 = vadd.f32 %v427_v10, %v399_v23  ;;  %v453_v33 = vadd.f32 %v427_v10, %v401_v24 }
  0x8f   : > { %v477_v34 = vpop.permute.xlu1 %476  ;;  %v1483_v35 = vmul.f32 %v1423_v43, %v1479_v29  ;;  %v1487_v36 = vmul.f32 %v1425_v44, %v1479_v29  ;;  %v1491_v37 = vmul.f32 %v1427_v45, %v1479_v29  ;;  %v1495_v38 = vmul.f32 %v1429_v46, %v1479_v29 }
  0x90   : > { %v568_v39 = vmul.f32 %v1439_v51, %v477_v34  ;;  %v570_v40 = vmul.f32 %v1441_v52, %v477_v34  ;;  %v567_v41 = vmul.f32 %v1443_v53, %v477_v34  ;;  %v569_v42 = vmul.f32 %v1445_v54, %v477_v34 }
  0x91   : > { %v572_v55 = vmul.f32 %v1447_v57, %v477_v34  ;;  %v574_v56 = vmul.f32 %v1449_v58, %v477_v34  ;;  %v571_v61 = vmul.f32 %v1451_v59, %v477_v34  ;;  %v573_v62 = vmul.f32 %v1453_v60, %v477_v34 }
  0x92   : > { %v600_v63 = vadd.f32 %v568_v39, %v448_v25  ;;  %v602_v0 = vadd.f32 %v570_v40, %v450_v26  ;;  %v599_v1 = vadd.f32 %v567_v41, %v447_v27  ;;  %v601_v3 = vadd.f32 %v569_v42, %v449_v28 }
  0x93   : > { %v1505_v4 = vpop.permute.xlu0 %472  ;;  %v1507_v5 = vadd.f32 %v572_v55, %v452_v30  ;;  %v1509_v10 = vadd.f32 %v574_v56, %v454_v31  ;;  %v1511_v11 = vadd.f32 %v571_v61, %v451_v32  ;;  %v1513_v17 = vadd.f32 %v573_v62, %v453_v33 }
  0x94   : > { %v1515_v18 = vpop.permute.xlu1 %305  ;;  %v560_v19 = vmul.f32 %v1439_v51, %v1505_v4  ;;  %v632_v20 = vmax.f32 %v600_v63, 0.0  ;;  %v562_v21 = vmul.f32 %v1441_v52, %v1505_v4  ;;  %v634_v22 = vmax.f32 %v602_v0, 0.0 }
  0x95   : > { %v559_v23 = vmul.f32 %v1443_v53, %v1505_v4  ;;  %v631_v24 = vmax.f32 %v599_v1, 0.0  ;;  %v561_v25 = vmul.f32 %v1445_v54, %v1505_v4  ;;  %v633_v26 = vmax.f32 %v601_v3, 0.0 }
  0x96   : > { %v592_v27 = vadd.f32 %v560_v19, %v440_v6  ;;  %v594_v28 = vadd.f32 %v562_v21, %v442_v7  ;;  %v404_v30 = vmul.f32 %v1423_v43, %v1515_v18  ;;  %v406_v31 = vmul.f32 %v1425_v44, %v1515_v18 }
  0x97   : > { %v1529_v32 = vpop.permute.xlu0 %480  ;;  %v591_v33 = vadd.f32 %v559_v23, %v439_v8  ;;  %v593_v34 = vadd.f32 %v561_v25, %v441_v9  ;;  %v403_v39 = vmul.f32 %v1427_v45, %v1515_v18  ;;  %v405_v40 = vmul.f32 %v1429_v46, %v1515_v18 }
  0x98   : > { %v1535_v41 = vpop.permute.xlu1 %431  ;;  %v624_v6 = vmax.f32 %v592_v27, 0.0  ;;  %v626_v7 = vmax.f32 %v594_v28, 0.0  ;;  %v576_v43 = vmul.f32 %v1439_v51, %v1529_v32  ;;  %v578_v44 = vmul.f32 %v1441_v52, %v1529_v32 }
  0x99   : > { %v623_v42 = vmax.f32 %v591_v33, 0.0  ;;  %v625_v55 = vmax.f32 %v593_v34, 0.0  ;;  %v456_v8 = vadd.f32 %v1535_v41, %v404_v30  ;;  %v458_v9 = vadd.f32 %v1535_v41, %v406_v31 }
  0x9a   : > { %v660_v45 = vpack.c.bf16 %v632_v20, %v624_v6  ;;  %v662_v56 = vpack.c.bf16 %v634_v22, %v626_v7  ;;  %v455_v46 = vadd.f32 %v1535_v41, %v403_v39  ;;  %v575_v61 = vmul.f32 %v1443_v53, %v1529_v32 }
  0x9b   : > { %v659_v62 = vpack.c.bf16 %v631_v24, %v623_v42  ;;  %v661_v63 = vpack.c.bf16 %v633_v26, %v625_v55  ;;  %v608_v0 = vadd.f32 %v576_v43, %v456_v8  ;;  %v610_v1 = vadd.f32 %v578_v44, %v458_v9 }
  0x9c   : > { %v1546_v3 = vpop.permute.xlu1 %436  ;;  %716 = vmatprep.subr.bf16.mxu0 %v660_v45  ;;  %769 = vmatprep.subr.bf16.mxu1 %v662_v56  ;;  %v607_v19 = vadd.f32 %v575_v61, %v455_v46  ;;  %v457_v21 = vadd.f32 %v1535_v41, %v405_v40  ;;  %v577_v20 = vmul.f32 %v1445_v54, %v1529_v32  ;;  %v636_v22 = vmax.f32 %v1507_v5, 0.0 }
  0x9d   : > { %717 = vmatpush1.bf16.msra.mxu0 %v659_v62  ;;  %770 = vmatpush1.bf16.msra.mxu1 %v661_v63  ;;  %v464_v23 = vadd.f32 %v1546_v3, %v1483_v35  ;;  %v640_v24 = vmax.f32 %v608_v0, 0.0  ;;  %v466_v25 = vadd.f32 %v1546_v3, %v1487_v36  ;;  %v642_v26 = vmax.f32 %v610_v1, 0.0 }
  0x9e   : > { %v463_v27 = vadd.f32 %v1546_v3, %v1491_v37  ;;  %v639_v28 = vmax.f32 %v607_v19, 0.0  ;;  %v465_v30 = vadd.f32 %v1546_v3, %v1495_v38  ;;  %v609_v31 = vadd.f32 %v577_v20, %v457_v21 }
  0x9f   : > { %v564_v5 = vmul.f32 %v1447_v57, %v1505_v4  ;;  %v566_v33 = vmul.f32 %v1449_v58, %v1505_v4  ;;  %v638_v35 = vmax.f32 %v1509_v10, 0.0  ;;  %v563_v36 = vmul.f32 %v1451_v59, %v1505_v4 }
  0xa0   : > { %v641_v34 = vmax.f32 %v609_v31, 0.0  ;;  %v635_v39 = vmax.f32 %v1511_v11, 0.0  ;;  %v565_v37 = vmul.f32 %v1453_v60, %v1505_v4  ;;  %v637_v38 = vmax.f32 %v1513_v17, 0.0 }
  0xa1   : > { %v1571_v40 = vpop.permute.xlu1 %484  ;;  %v596_v6 = vadd.f32 %v564_v5, %v1463_v12  ;;  %v598_v7 = vadd.f32 %v566_v33, %v1465_v13  ;;  %v595_v43 = vadd.f32 %v563_v36, %v1467_v14  ;;  %v408_v10 = vmul.f32 %v1431_v47, %v1515_v18 }
  0xa2   : > { %v584_v44 = vmul.f32 %v1439_v51, %v1571_v40  ;;  %v586_v11 = vmul.f32 %v1441_v52, %v1571_v40  ;;  %v583_v4 = vmul.f32 %v1443_v53, %v1571_v40  ;;  %v585_v17 = vmul.f32 %v1445_v54, %v1571_v40 }
  0xa3   : > { %v628_v12 = vmax.f32 %v596_v6, 0.0  ;;  %v630_v42 = vmax.f32 %v598_v7, 0.0  ;;  %v627_v13 = vmax.f32 %v595_v43, 0.0  ;;  %v597_v14 = vadd.f32 %v565_v37, %v1469_v15 }
  0xa4   : > { %v616_v55 = vadd.f32 %v584_v44, %v464_v23  ;;  %v618_v8 = vadd.f32 %v586_v11, %v466_v25  ;;  %v615_v9 = vadd.f32 %v583_v4, %v463_v27  ;;  %v617_v45 = vadd.f32 %v585_v17, %v465_v30 }
  0xa5   : > { %v664_v56 = vpack.c.bf16 %v636_v22, %v628_v12  ;;  %v666_v51 = vpack.c.bf16 %v638_v35, %v630_v42  ;;  %v663_v46 = vpack.c.bf16 %v635_v39, %v627_v13  ;;  %v629_v61 = vmax.f32 %v597_v14, 0.0 }
  0xa6   : > { %v648_v52 = vmax.f32 %v616_v55, 0.0  ;;  %v650_v62 = vmax.f32 %v618_v8, 0.0  ;;  %v647_v63 = vmax.f32 %v615_v9, 0.0  ;;  %v649_v53 = vmax.f32 %v617_v45, 0.0 }
  0xa7   : > { %v665_v0 = vpack.c.bf16 %v637_v38, %v629_v61  ;;  %v416_v54 = vmul.f32 %v1431_v47, %v1479_v29  ;;  %v460_v1 = vadd.f32 %v1535_v41, %v408_v10  ;;  %v580_v15 = vmul.f32 %v1447_v57, %v1529_v32  ;;  %v1296_v47 = vld [vmem:[%s1708_s3] sm:$0xff]  }
  0xa8   : > { %v668_v19 = vpack.c.bf16 %v648_v52, %v640_v24  ;;  %v670_v21 = vpack.c.bf16 %v650_v62, %v642_v26  ;;  %v667_v20 = vpack.c.bf16 %v647_v63, %v639_v28  ;;  %v669_v22 = vpack.c.bf16 %v649_v53, %v641_v34 }
  0xa9   : > { %v468_v23 = vadd.f32 %v1546_v3, %v416_v54  ;;  %v588_v25 = vmul.f32 %v1447_v57, %v1571_v40  ;;  %v612_v27 = vadd.f32 %v580_v15, %v460_v1  ;;  %v410_v30 = vmul.f32 %v1433_v48, %v1515_v18 }
  0xaa   : > { %718 = vmatprep.subr.bf16.mxu0 %v668_v19  ;;  %771 = vmatprep.subr.bf16.mxu1 %v670_v21  ;;  %v418_v24 = vmul.f32 %v1433_v48, %v1479_v29  ;;  %v582_v26 = vmul.f32 %v1449_v58, %v1529_v32  ;;  %v590_v28 = vmul.f32 %v1449_v58, %v1571_v40 }
  0xab   : > { %719 = vmatpush1.bf16.msra.mxu0 %v667_v20  ;;  %772 = vmatpush1.bf16.msra.mxu1 %v669_v22  ;;  %v620_v57 = vadd.f32 %v588_v25, %v468_v23  ;;  %v462_v31 = vadd.f32 %v1535_v41, %v410_v30  ;;  %v407_v5 = vmul.f32 %v1435_v49, %v1515_v18  ;;  %v644_v33 = vmax.f32 %v612_v27, 0.0 }
  0xac   : > { %822 = vmatprep.subr.bf16.mxu0 %v664_v56  ;;  %875 = vmatprep.subr.bf16.mxu1 %v666_v51  ;;  %v470_v48 = vadd.f32 %v1546_v3, %v418_v24  ;;  %v415_v35 = vmul.f32 %v1435_v49, %v1479_v29  ;;  %v579_v58 = vmul.f32 %v1451_v59, %v1529_v32 }
  0xad   : > { %v652_v36 = vmax.f32 %v620_v57, 0.0  ;;  %v614_v34 = vadd.f32 %v582_v26, %v462_v31  ;;  %v459_v39 = vadd.f32 %v1535_v41, %v407_v5  ;;  %v587_v37 = vmul.f32 %v1451_v59, %v1571_v40 }
  0xae   : > { %1263 = vmatmul.mubr.msk.bf16.vlgmr.msra.gmra.mrb[0].mxu0 %vm709_vm0, %v1296_v47  ;;  %1265 = vmatmul.mubr.msk.bf16.vlgmr.msra.gmra.mrb[0].mxu1 %vm709_vm0, %v1296_v47  ;;  %v622_v38 = vadd.f32 %v590_v28, %v470_v48  ;;  %v467_v6 = vadd.f32 %v1546_v3, %v415_v35  ;;  %v409_v49 = vmul.f32 %v1437_v50, %v1515_v18 }
  0xaf   : > { %823 = vmatpush1.bf16.msra.mxu0 %v663_v46  ;;  %876 = vmatpush1.bf16.msra.mxu1 %v665_v0  ;;  %v672_v7 = vpack.c.bf16 %v652_v36, %v644_v33  ;;  %v646_v43 = vmax.f32 %v614_v34, 0.0  ;;  %v611_v10 = vadd.f32 %v579_v58, %v459_v39  ;;  %v417_v44 = vmul.f32 %v1437_v50, %v1479_v29 }
  0xb0   : > { %v654_v11 = vmax.f32 %v622_v38, 0.0  ;;  %v619_v59 = vadd.f32 %v587_v37, %v467_v6  ;;  %v461_v4 = vadd.f32 %v1535_v41, %v409_v49  ;;  %v581_v17 = vmul.f32 %v1453_v60, %v1529_v32  ;;  %758 = vmatprep.mubr.bf16.mxu0 %v1306_v2  ;;  %811 = vmatprep.mubr.bf16.mxu1 %v1306_v2  ;;  %v1297_v41 = vld [vmem:[%s1708_s3 + $0x8] sm:$0xff]  }
  0xb1   : > { %824 = vmatprep.subr.bf16.mxu0 %v672_v7  ;;  %v469_v18 = vadd.f32 %v1546_v3, %v417_v44  ;;  %v589_v12 = vmul.f32 %v1453_v60, %v1571_v40  ;;  %v643_v13 = vmax.f32 %v611_v10, 0.0  ;;  %v1647_v60 = vpop.permute.xlu1 %681  ;;  %v1649_v40 = vpop.permute.xlu0 %686 }
  0xb2   : > { %v674_v42 = vpack.c.bf16 %v654_v11, %v646_v43  ;;  %v651_v50 = vmax.f32 %v619_v59, 0.0  ;;  %v613_v29 = vadd.f32 %v581_v17, %v461_v4 }
  0xb3   : > { %v621_v14 = vadd.f32 %v589_v12, %v469_v18 }
  0xb4   : > { %877 = vmatprep.subr.bf16.mxu1 %v674_v42  ;;  %v671_v32 = vpack.c.bf16 %v651_v50, %v643_v13  ;;  %v645_v55 = vmax.f32 %v613_v29, 0.0 }
  0xb5   : > { %v653_v8 = vmax.f32 %v621_v14, 0.0  ;;  %v1651_v9 = vpop.permute.xlu1 %691 }
  0xb6   : > { %825 = vmatpush1.bf16.msra.mxu0 %v671_v32  ;;  %1266 = vmatmul.mubr.msk.bf16.gmra.mrb[4].mxu1 %vm709_vm0, %v1297_v41 }
  0xb7   : > { %v673_v3 = vpack.c.bf16 %v653_v8, %v645_v55  ;;  %1264 = vmatmul.mubr.msk.bf16.gmra.mrb[4].mxu0 %vm709_vm0, %v1297_v41  ;;  %907 = vmatprep.mubr.bf16.mxu1 %v1306_v2 }
  0xb8   : > { %854 = vmatprep.mubr.bf16.mxu0 %v1306_v2 }
  0xb9   : > { %878 = vmatpush1.bf16.msra.mxu1 %v673_v3  ;;  %v1661_v33 = vpop.permute.xlu1 %696 }
  0xbe   : > { %1269 = vmatmul.mubr.msk.bf16.vlgmr.msra.gmra.mrb[8].mxu1 %vm709_vm0, %v1296_v47 }
  0xbf   : > { %1267 = vmatmul.mubr.msk.bf16.vlgmr.msra.gmra.mrb[8].mxu0 %vm709_vm0, %v1296_v47  ;;  %917 = vmatprep.mubr.bf16.mxu1 %v1306_v2 }
  0xc0   : > { %864 = vmatprep.mubr.bf16.mxu0 %v1306_v2 }
  0xc6   : > { %1270 = vmatmul.mubr.msk.bf16.gmra.mrb[12].mxu1 %vm709_vm0, %v1297_v41 }
  0xc7   : > { %1268 = vmatmul.mubr.msk.bf16.gmra.mrb[12].mxu0 %vm709_vm0, %v1297_v41  ;;  %1059 = vmatprep.mubr.bf16.mxu1 %v1306_v2 }
  0xc8   : > { %1018 = vmatprep.mubr.bf16.mxu0 %v1306_v2 }
 0x181   : > { %v750_v45 = vpop.f32.mrb[0].mxu0  ;;  %v803_v56 = vpop.f32.mrb[0].mxu1 }
 0x182   : > { %v751_v51 = vadd.f32 %v750_v45, %v1647_v60  ;;  %v804_v46 = vadd.f32 %v803_v56, %v1647_v60  ;;  %v752_v61 = vpop.f32.mrb[1].mxu0  ;;  %v805_v52 = vpop.f32.mrb[1].mxu1 }
 0x183   : > { %v753_v62 = vadd.f32 %v752_v61, %v1647_v60  ;;  %v806_v63 = vadd.f32 %v805_v52, %v1647_v60  ;;  %v754_v53 = vpop.f32.mrb[2].mxu0  ;;  %v807_v0 = vpop.f32.mrb[2].mxu1 }
 0x184   : > { %v755_v54 = vadd.f32 %v754_v53, %v1649_v40  ;;  %v808_v1 = vadd.f32 %v807_v0, %v1649_v40  ;;  %v756_v15 = vpop.f32.mrb[3].mxu0  ;;  %v809_v19 = vpop.f32.mrb[3].mxu1  ;;  %v928_v22 = vmax.f32 %v751_v51, 0.0  ;;  %v930_v23 = vmax.f32 %v804_v46, 0.0 }
 0x185   : > { %v757_v21 = vadd.f32 %v756_v15, %v1649_v40  ;;  %v810_v20 = vadd.f32 %v809_v19, %v1649_v40  ;;  %v929_v30 = vmax.f32 %v753_v62, 0.0  ;;  %v931_v47 = vmax.f32 %v806_v63, 0.0 }
 0x186   : > { %v936_v25 = vmax.f32 %v755_v54, 0.0  ;;  %v938_v27 = vmax.f32 %v808_v1, 0.0  ;;  %v960_v54 = vld [vmem:[%s1710_s5] sm:$0x1] }
 0x187   : > { %v937_v24 = vmax.f32 %v757_v21, 0.0  ;;  %v939_v26 = vmax.f32 %v810_v20, 0.0 }
 0x188   : > { %v961_v28 = vpack.c.bf16 %v936_v25, %v928_v22  ;;  %v963_v57 = vpack.c.bf16 %v938_v27, %v930_v23 }
 0x189   : > { %v962_v31 = vpack.c.bf16 %v937_v24, %v929_v30  ;;  %v964_v5 = vpack.c.bf16 %v939_v26, %v931_v47  ;;  %v813_v48 = vpop.f32.mrb[4].mxu1 }
 0x18a   : > { %v760_v35 = vpop.f32.mrb[4].mxu0  ;;  %v814_v58 = vadd.f32 %v813_v48, %v1651_v9  ;;  %v815_v36 = vpop.f32.mrb[5].mxu1 }
 0x18b   : > { %v761_v34 = vadd.f32 %v760_v35, %v1651_v9  ;;  %v762_v39 = vpop.f32.mrb[5].mxu0  ;;  %v816_v37 = vadd.f32 %v815_v36, %v1651_v9  ;;  %v817_v38 = vpop.f32.mrb[6].mxu1  ;;  %986 = vmatprep.subr.bf16.mxu0 %v962_v31  ;;  %1027 = vmatprep.subr.bf16.mxu1 %v964_v5 }
 0x18c   : > { %v763_v6 = vadd.f32 %v762_v39, %v1651_v9  ;;  %v764_v49 = vpop.f32.mrb[6].mxu0  ;;  %v818_v7 = vadd.f32 %v817_v38, %v1661_v33  ;;  %v819_v43 = vpop.f32.mrb[7].mxu1  ;;  %987 = vmatpush1.bf16.msra.mxu0 %v961_v28  ;;  %1028 = vmatpush1.bf16.msra.mxu1 %v963_v57  ;;  %v946_v59 = vmax.f32 %v814_v58, 0.0 }
 0x18d   : > { %v765_v10 = vadd.f32 %v764_v49, %v1661_v33  ;;  %v766_v44 = vpop.f32.mrb[7].mxu0  ;;  %v820_v11 = vadd.f32 %v819_v43, %v1661_v33  ;;  %v944_v18 = vmax.f32 %v761_v34, 0.0  ;;  %v947_v12 = vmax.f32 %v816_v37, 0.0 }
 0x18e   : > { %v954_v4 = vmax.f32 %v818_v7, 0.0  ;;  %v767_v17 = vadd.f32 %v766_v44, %v1661_v33  ;;  %v945_v50 = vmax.f32 %v763_v6, 0.0 }
 0x18f   : > { %v952_v42 = vmax.f32 %v765_v10, 0.0  ;;  %v955_v13 = vmax.f32 %v820_v11, 0.0 }
 0x190   : > { %v971_v29 = vpack.c.bf16 %v954_v4, %v946_v59  ;;  %v953_v41 = vmax.f32 %v767_v17, 0.0 }
 0x191   : > { %v969_v14 = vpack.c.bf16 %v952_v42, %v944_v18  ;;  %v972_v32 = vpack.c.bf16 %v955_v13, %v947_v12  ;;  %v909_v55 = vpop.f32.mrb[8].mxu1 }
 0x192   : > { %v970_v8 = vpack.c.bf16 %v953_v41, %v945_v50  ;;  %v856_v3 = vpop.f32.mrb[8].mxu0  ;;  %v910_v45 = vadd.f32 %v909_v55, %v1647_v60  ;;  %v911_v56 = vpop.f32.mrb[9].mxu1 }
 0x193   : > { %v857_v51 = vadd.f32 %v856_v3, %v1647_v60  ;;  %v858_v46 = vpop.f32.mrb[9].mxu0  ;;  %v912_v61 = vadd.f32 %v911_v56, %v1647_v60  ;;  %v913_v52 = vpop.f32.mrb[10].mxu1  ;;  %1029 = vmatprep.subr.bf16.mxu1 %v972_v32 }
 0x194   : > { %v859_v62 = vadd.f32 %v858_v46, %v1647_v60  ;;  %v860_v63 = vpop.f32.mrb[10].mxu0  ;;  %v914_v53 = vadd.f32 %v913_v52, %v1649_v40  ;;  %988 = vmatprep.subr.bf16.mxu0 %v970_v8  ;;  %v915_v0 = vpop.f32.mrb[11].mxu1  ;;  %1030 = vmatpush1.bf16.msra.mxu1 %v971_v29  ;;  %v934_v21 = vmax.f32 %v910_v45, 0.0  ;;  %v1308_v29 = vmov 1983009808  }
 0x195   : > { %v861_v1 = vadd.f32 %v860_v63, %v1649_v40  ;;  %v862_v15 = vpop.f32.mrb[11].mxu0  ;;  %v916_v19 = vadd.f32 %v915_v0, %v1649_v40  ;;  %989 = vmatpush1.bf16.msra.mxu0 %v969_v14  ;;  %v932_v22 = vmax.f32 %v857_v51, 0.0  ;;  %v935_v23 = vmax.f32 %v912_v61, 0.0  ;;  %v981_v14 = vpop.permute.xlu0 %980 }
 0x196   : > { %v942_v20 = vmax.f32 %v914_v53, 0.0  ;;  %v863_v60 = vadd.f32 %v862_v15, %v1649_v40  ;;  %v933_v30 = vmax.f32 %v859_v62, 0.0 }
 0x197   : > { %v940_v25 = vmax.f32 %v861_v1, 0.0  ;;  %v943_v27 = vmax.f32 %v916_v19, 0.0  ;;  %1272 = vmatmul.mubr.msk.bf16.vlgmr.msra.gmra.mrb[16].mxu1 %vm709_vm0, %v960_v54 }
 0x198   : > { %v967_v47 = vpack.c.bf16 %v942_v20, %v934_v21  ;;  %v941_v24 = vmax.f32 %v863_v60, 0.0  ;;  %1271 = vmatmul.mubr.msk.bf16.vlgmr.msra.gmra.mrb[16].mxu0 %vm709_vm0, %v960_v54  ;;  %1141 = vmatprep.mubr.bf16.mxu1 %v1306_v2 }
 0x199   : > { %v965_v26 = vpack.c.bf16 %v940_v25, %v932_v22  ;;  %v968_v28 = vpack.c.bf16 %v943_v27, %v935_v23  ;;  %v919_v57 = vpop.f32.mrb[12].mxu1  ;;  %1100 = vmatprep.mubr.bf16.mxu0 %v1306_v2 }
 0x19a   : > { %v966_v31 = vpack.c.bf16 %v941_v24, %v933_v30  ;;  %v866_v40 = vpop.f32.mrb[12].mxu0  ;;  %v920_v5 = vadd.f32 %v919_v57, %v1651_v9  ;;  %v921_v48 = vpop.f32.mrb[13].mxu1 }
 0x19b   : > { %v867_v35 = vadd.f32 %v866_v40, %v1651_v9  ;;  %v868_v58 = vpop.f32.mrb[13].mxu0  ;;  %v922_v36 = vadd.f32 %v921_v48, %v1651_v9  ;;  %v923_v34 = vpop.f32.mrb[14].mxu1  ;;  %1109 = vmatprep.subr.bf16.mxu1 %v968_v28 }
 0x19c   : > { %v869_v39 = vadd.f32 %v868_v58, %v1651_v9  ;;  %v870_v37 = vpop.f32.mrb[14].mxu0  ;;  %v924_v38 = vadd.f32 %v923_v34, %v1661_v33  ;;  %1068 = vmatprep.subr.bf16.mxu0 %v966_v31  ;;  %v925_v6 = vpop.f32.mrb[15].mxu1  ;;  %1110 = vmatpush1.bf16.msra.mxu1 %v967_v47  ;;  %v950_v43 = vmax.f32 %v920_v5, 0.0 }
 0x19d   : > { %v871_v2 = vadd.f32 %v870_v37, %v1661_v33  ;;  %v872_v49 = vpop.f32.mrb[15].mxu0  ;;  %v926_v7 = vadd.f32 %v925_v6, %v1661_v33  ;;  %1069 = vmatpush1.bf16.msra.mxu0 %v965_v26  ;;  %v948_v11 = vmax.f32 %v867_v35, 0.0  ;;  %v951_v59 = vmax.f32 %v922_v36, 0.0 }
 0x19e   : > { %v958_v10 = vmax.f32 %v924_v38, 0.0  ;;  %v873_v44 = vadd.f32 %v872_v49, %v1661_v33  ;;  %v949_v17 = vmax.f32 %v869_v39, 0.0  ;;  %v1161_v33 = vunpack.c.l.s4 %v1308_v29 }
 0x19f   : > { %v956_v4 = vmax.f32 %v871_v2, 0.0  ;;  %v959_v9 = vmax.f32 %v926_v7, 0.0 }
 0x1a0   : > { %v975_v18 = vpack.c.bf16 %v958_v10, %v950_v43  ;;  %v957_v12 = vmax.f32 %v873_v44, 0.0  ;;  %v1162_v41 = vunpack.c.0.s8 %v1161_v33 }
 0x1a1   : > { %v973_v42 = vpack.c.bf16 %v956_v4, %v948_v11  ;;  %v976_v13 = vpack.c.bf16 %v959_v9, %v951_v59 }
 0x1a2   : > { %v974_v50 = vpack.c.bf16 %v957_v12, %v949_v17  ;;  %v1165_v51 = vsub.s32 %v1162_v41, %v1408_v16 }
 0x1a3   : > { %1111 = vmatprep.subr.bf16.mxu1 %v976_v13 }
 0x1a4   : > { %1070 = vmatprep.subr.bf16.mxu0 %v974_v50  ;;  %1112 = vmatpush1.bf16.msra.mxu1 %v975_v18 }
 0x1a5   : > { %1071 = vmatpush1.bf16.msra.mxu0 %v973_v42 }
 0x1a7   : > { %1274 = vmatmul.mubr.msk.bf16.vlgmr.msra.gmra.mrb[20].mxu1 %vm709_vm0, %v960_v54 }
 0x1a8   : > { %1273 = vmatmul.mubr.msk.bf16.vlgmr.msra.gmra.mrb[20].mxu0 %vm709_vm0, %v960_v54 }
 0x26a   : > { %v1061_v32 = vpop.f32.mrb[16].mxu1 }
 0x26b   : > { %v1020_v55 = vpop.f32.mrb[16].mxu0  ;;  %v1062_v8 = vadd.f32 %v1061_v32, %v981_v14  ;;  %v1063_v3 = vpop.f32.mrb[17].mxu1 }
 0x26c   : > { %v1021_v45 = vadd.f32 %v1020_v55, %v981_v14  ;;  %v1022_v56 = vpop.f32.mrb[17].mxu0  ;;  %v1064_v46 = vadd.f32 %v1063_v3, %v981_v14  ;;  %v1065_v61 = vpop.f32.mrb[18].mxu1 }
 0x26d   : > { %v1023_v52 = vadd.f32 %v1022_v56, %v981_v14  ;;  %v1024_v62 = vpop.f32.mrb[18].mxu0  ;;  %v1066_v63 = vpop.f32.mrb[19].mxu1 }
 0x26e   : > { %v1159_v53 = vcombine.low %v1062_v8, %v1064_v46  ;;  %v1025_v0 = vpop.f32.mrb[19].mxu0 }
 0x26f   : > { %v1158_v54 = vcombine.low %v1021_v45, %v1023_v52 }
 0x270   : > { %v1173_v1 = vrot.slane %v1159_v53, %v1165_v51 }
 0x271   : > { %v1166_v15 = vrot.slane %v1158_v54, %v1165_v51 }
 0x273   : > { %v1174_v19 = vcombine.low %v1166_v15, %v1173_v1 }
 0x275   : > { %1194 = vst [vmem:[%s280_s20] sm:$0xff] %v1174_v19 }
 0x27a   : > { %v1143_v21 = vpop.f32.mrb[20].mxu1 }
 0x27b   : > { %v1102_v20 = vpop.f32.mrb[20].mxu0  ;;  %v1144_v16 = vadd.f32 %v1143_v21, %v981_v14  ;;  %v1145_v60 = vpop.f32.mrb[21].mxu1 }
 0x27c   : > { %v1103_v22 = vadd.f32 %v1102_v20, %v981_v14  ;;  %v1104_v23 = vpop.f32.mrb[21].mxu0  ;;  %v1146_v25 = vadd.f32 %v1145_v60, %v981_v14  ;;  %v1147_v27 = vpop.f32.mrb[22].mxu1 }
 0x27d   : > { %v1105_v30 = vadd.f32 %v1104_v23, %v981_v14  ;;  %v1106_v47 = vpop.f32.mrb[22].mxu0  ;;  %v1148_v24 = vpop.f32.mrb[23].mxu1 }
 0x27e   : > { %v1176_v26 = vcombine.low %v1144_v16, %v1146_v25  ;;  %v1107_v28 = vpop.f32.mrb[23].mxu0 }
 0x27f   : > { %v1175_v57 = vcombine.low %v1103_v22, %v1105_v30 }
 0x280   : > { %v1190_v31 = vrot.slane %v1176_v26, %v1165_v51 }
 0x281   : > { %v1183_v40 = vrot.slane %v1175_v57, %v1165_v51 }
 0x283   : > { %v1191_v5 = vcombine.low %v1183_v40, %v1190_v31 }
 0x285   : > { %1195 = vst [vmem:[%s280_s20 + $0x8] sm:$0xff] %v1191_v5 }
 0x286 PF: > { %s17_s24 = sadd.s32 1, %s1304_s24  }
 0x287   : > { %p14_p4 = scmp.ge.s32.totalorder %s17_s24, 10  }
 0x289   :  { %16 = sbr.rel (!%p14_p4) target bundleno = 1 (0x1), region = 78 }

</bundles_post_ra>
